<compile_context>
chip_gen: v7x
topology: tpu7x:2x2x1
jax: 0.10.0
libtpu: 0.0.40
codegen_flags: <defaults>
</compile_context>

<pallas_src>
import math

import jax
import jax.numpy as jnp
from jax.experimental import pallas as pl
from jax.experimental.pallas import tpu as pltpu

# ---- model dimensions (small, consistent with the forward semantics) ----
B, T = 2, 8
D_VIDEO, D_MODEL, HIDDEN = 32, 32, 32
LATENT = 16
N_EMO, N_EVENT, N_STIM, N_GROUP = 8, 4, 4, 4

BT = B * T
XV_COLS = 40  # D_VIDEO + 2 (va), zero-padded to a multiple of 8 sublanes

# weight-slab row offsets (all multiples of 8 sublanes; every block 32 lanes)
OFF_VID, ROWS_VID = 0, 40      # [wv ; wva ; 0-pad]            (40, 32)
OFF_ENC, ROWS_ENC = 40, 64     # [wenc_p ; wenc_g]             (64, 32)
OFF_MULV, ROWS_MULV = 104, 32  # [wmu | wlv]                   (32, 32)
OFF_Z, ROWS_Z = 136, 16        # wz                            (16, 32)
OFF_DEC, ROWS_DEC = 152, 32    # wdec                          (32, 32)
OFF_OUT, ROWS_OUT = 184, 32    # wout, cols zero-padded 8->32  (32, 32)
W_ROWS = 216
OUT_ROWS = BT + B              # packed output: recon rows + [mu|logvar] rows


def emotion_cvae_kernel(xv_ref, xrow_ref, xb_ref, w_ref, b_ref, out_ref):
    f32 = jnp.float32
    xv = xv_ref[...]      # (BT, 40)  [video | va | 0-pad]
    xrow = xrow_ref[...]  # (BT, 96)  [cond_stim_bt | enc_emb | dec_emb]
    xb = xb_ref[...]      # (B, 80)   [grp_enc | grp_gen | eps]
    W = w_ref[...]        # (216, 32) all dense weights, row-stacked
    Bs = b_ref[...]       # (6, 32)   all biases, row-stacked

    # ---------------- StimulusEncoder ----------------
    # relu(video@wv + va@wva + (bv+bva) + e_event[ev] + e_stim[st])
    vproj = jnp.dot(xv, W[OFF_VID:OFF_VID + ROWS_VID, :],
                    preferred_element_type=f32) + Bs[0:1, :]
    stim_mem = jnp.maximum(vproj + xrow[:, 0:D_MODEL], 0.0)            # (BT, D)

    # ---------------- LatentEncoder ----------------
    enc_emb = xrow[:, D_MODEL:2 * D_MODEL]                             # (BT, D)
    pooled = jnp.concatenate(
        [jnp.mean(enc_emb[b * T:(b + 1) * T, :], axis=0, keepdims=True)
         for b in range(B)], axis=0)                                   # (B, D)
    enc_in = jnp.concatenate([pooled, xb[:, 0:D_MODEL]], axis=1)       # (B, 2D)
    h = jnp.maximum(
        jnp.dot(enc_in, W[OFF_ENC:OFF_ENC + ROWS_ENC, :],
                preferred_element_type=f32) + Bs[1:2, :], 0.0)         # (B, HIDDEN)
    mulv = jnp.dot(h, W[OFF_MULV:OFF_MULV + ROWS_MULV, :],
                   preferred_element_type=f32) + Bs[2:3, :]            # (B, 2*LATENT)
    mu = mulv[:, 0:LATENT]
    logvar = mulv[:, LATENT:2 * LATENT]

    # ---------------- reparameterize ----------------
    eps = xb[:, 2 * D_MODEL:2 * D_MODEL + LATENT]
    z = mu + eps * jnp.exp(0.5 * logvar)                               # (B, LATENT)

    # ---------------- EmotionGenerator ----------------
    zp = jnp.dot(z, W[OFF_Z:OFF_Z + ROWS_Z, :],
                 preferred_element_type=f32) + Bs[3:4, :]              # (B, D)
    gen_cond = zp + xb[:, D_MODEL:2 * D_MODEL]                         # (B, D)
    gen_cond_bt = jnp.concatenate(
        [jnp.broadcast_to(gen_cond[b:b + 1, :], (T, D_MODEL))
         for b in range(B)], axis=0)                                   # (BT, D)
    dec_in = xrow[:, 2 * D_MODEL:3 * D_MODEL] + gen_cond_bt            # (BT, D)

    # single-head attention over stimulus_memory, unrolled over B=2
    scale = 1.0 / math.sqrt(D_MODEL)
    ctx_blocks = []
    for b in range(B):
        dec_b = dec_in[b * T:(b + 1) * T, :]                           # (T, D)
        mem_b = stim_mem[b * T:(b + 1) * T, :]                         # (T, D)
        s = jnp.dot(dec_b, mem_b.T, preferred_element_type=f32) * scale
        s = s - jnp.max(s, axis=-1, keepdims=True)
        p = jnp.exp(s)
        attn = p * pl.reciprocal(jnp.sum(p, axis=-1, keepdims=True), approx=True)
        ctx_blocks.append(jnp.dot(attn, mem_b, preferred_element_type=f32))
    ctx = jnp.concatenate(ctx_blocks, axis=0)                          # (BT, D)

    h2 = jnp.maximum(
        jnp.dot(dec_in + ctx, W[OFF_DEC:OFF_DEC + ROWS_DEC, :],
                preferred_element_type=f32) + Bs[4:5, :], 0.0)         # (BT, D)
    logits = jnp.dot(h2, W[OFF_OUT:OFF_OUT + ROWS_OUT, :],
                     preferred_element_type=f32) + Bs[5:6, :]          # (BT, 32); lanes >= N_EMO are 0

    # one packed output slab: rows [0,BT) = recon logits, rows [BT,BT+B) = mu||logvar
    out_ref[0:BT, :] = logits
    out_ref[BT:BT + B, :] = mulv


def init_params(key):
    def dense(k, fan_in, shape):
        return jax.random.normal(k, shape, jnp.float32) / math.sqrt(fan_in)

    ks = jax.random.split(key, 23)
    p = {}
    # StimulusEncoder
    p['wv'] = dense(ks[0], D_VIDEO, (D_VIDEO, D_MODEL))
    p['bv'] = jnp.zeros((1, D_MODEL), jnp.float32)
    p['e_event'] = dense(ks[1], 1, (N_EVENT, D_MODEL))
    p['e_stim'] = dense(ks[2], 1, (N_STIM, D_MODEL))
    p['wva'] = dense(ks[3], 2, (2, D_MODEL))
    p['bva'] = jnp.zeros((1, D_MODEL), jnp.float32)
    # LatentEncoder
    p['e_emo'] = dense(ks[4], 1, (N_EMO, D_MODEL))
    p['e_group_enc'] = dense(ks[5], 1, (N_GROUP, D_MODEL))
    p['wenc_p'] = dense(ks[6], D_MODEL, (D_MODEL, HIDDEN))
    p['wenc_g'] = dense(ks[7], D_MODEL, (D_MODEL, HIDDEN))
    p['benc'] = jnp.zeros((1, HIDDEN), jnp.float32)
    p['wmu'] = dense(ks[8], HIDDEN, (HIDDEN, LATENT))
    p['bmu'] = jnp.zeros((1, LATENT), jnp.float32)
    p['wlv'] = dense(ks[9], HIDDEN, (HIDDEN, LATENT))
    p['blv'] = jnp.zeros((1, LATENT), jnp.float32)
    # EmotionGenerator
    p['wz'] = dense(ks[10], LATENT, (LATENT, D_MODEL))
    p['bz'] = jnp.zeros((1, D_MODEL), jnp.float32)
    p['e_group_gen'] = dense(ks[11], 1, (N_GROUP, D_MODEL))
    p['e_emo_dec'] = dense(ks[12], 1, (N_EMO, D_MODEL))
    p['wdec'] = dense(ks[13], D_MODEL, (D_MODEL, D_MODEL))
    p['bdec'] = jnp.zeros((1, D_MODEL), jnp.float32)
    p['wout'] = dense(ks[14], D_MODEL, (D_MODEL, N_EMO))
    p['bout'] = jnp.zeros((1, N_EMO), jnp.float32)
    return p


def build_slabs(p):
    """Pack all dense weights / biases into two slabs (one DMA each)."""
    f32 = jnp.float32
    w_vid = jnp.concatenate([p['wv'], p['wva']], axis=0)               # (34, 32)
    w_vid = jnp.pad(w_vid, ((0, ROWS_VID - w_vid.shape[0]), (0, 0)))   # (40, 32)
    w_enc = jnp.concatenate([p['wenc_p'], p['wenc_g']], axis=0)        # (64, 32)
    w_mulv = jnp.concatenate([p['wmu'], p['wlv']], axis=1)             # (32, 32)
    w_z = p['wz']                                                      # (16, 32)
    w_dec = p['wdec']                                                  # (32, 32)
    w_out = jnp.pad(p['wout'], ((0, 0), (0, D_MODEL - N_EMO)))         # (32, 32)
    w_slab = jnp.concatenate([w_vid, w_enc, w_mulv, w_z, w_dec, w_out],
                             axis=0).astype(f32)                       # (216, 32)
    assert w_slab.shape == (W_ROWS, D_MODEL)

    b_slab = jnp.stack([
        (p['bv'] + p['bva'])[0],                                       # stim bias
        p['benc'][0],
        jnp.concatenate([p['bmu'][0], p['blv'][0]]),                   # [bmu|blv]
        p['bz'][0],
        p['bdec'][0],
        jnp.concatenate([p['bout'][0], jnp.zeros((D_MODEL - N_EMO,), f32)]),
    ], axis=0).astype(f32)                                             # (6, 32)
    return w_slab, b_slab


def emotion_cvae_forward(batch, params, eps):
    """JAX glue: embedding gathers + slab packing, then one fused kernel call."""
    f32 = jnp.float32
    video = batch['video_features'].astype(f32).reshape(BT, D_VIDEO)
    va = batch['va_values'].astype(f32)
    va_bt = jnp.repeat(va, T, axis=0)                                   # (BT, 2)
    xv = jnp.concatenate(
        [video, va_bt, jnp.zeros((BT, XV_COLS - D_VIDEO - 2), f32)], axis=1)

    # categorical embeddings: XLA gathers in glue, not one-hot MXU matmuls
    cond_stim = (params['e_event'][batch['event_type']] +
                 params['e_stim'][batch['stim_type']])                  # (B, D)
    cond_stim_bt = jnp.repeat(cond_stim, T, axis=0)                     # (BT, D)
    seq = batch['true_emo_seq'].reshape(BT)
    enc_emb = params['e_emo'][seq]                                      # (BT, D)
    dec_emb = params['e_emo_dec'][seq]                                  # (BT, D)
    xrow = jnp.concatenate([cond_stim_bt, enc_emb, dec_emb], axis=1)    # (BT, 96)

    grp_enc = params['e_group_enc'][batch['group_label']]               # (B, D)
    grp_gen = params['e_group_gen'][batch['group_label']]               # (B, D)
    xb = jnp.concatenate([grp_enc, grp_gen, eps.astype(f32)], axis=1)   # (B, 80)

    w_slab, b_slab = build_slabs(params)

    inputs = (xv, xrow, xb, w_slab, b_slab)
    vmem = pl.BlockSpec(memory_space=pltpu.MemorySpace.VMEM)
    bytes_accessed = sum(int(a.size) * 4 for a in inputs) + OUT_ROWS * D_MODEL * 4
    cost = pl.CostEstimate(flops=150_000, transcendentals=200,
                           bytes_accessed=int(bytes_accessed))

    out = pl.pallas_call(
        emotion_cvae_kernel,
        out_shape=jax.ShapeDtypeStruct((OUT_ROWS, D_MODEL), f32),
        in_specs=[vmem] * len(inputs),
        out_specs=vmem,
        cost_estimate=cost,
    )(*inputs)

    recon_logits = out[:BT, :N_EMO].reshape(B, T, N_EMO)
    mu = out[BT:, :LATENT]
    logvar = out[BT:, LATENT:2 * LATENT]
    return recon_logits, mu, logvar


if __name__ == "__main__":
    key = jax.random.PRNGKey(0)
    k_param, k_vid, k_va, k_ev, k_st, k_gr, k_emo, k_eps = jax.random.split(key, 8)

    params = init_params(k_param)

    batch = {
        'video_features': jax.random.normal(k_vid, (B, T, D_VIDEO), jnp.float32),
        'event_type': jax.random.randint(k_ev, (B,), 0, N_EVENT, jnp.int32),
        'va_values': jax.random.normal(k_va, (B, 2), jnp.float32),
        'group_label': jax.random.randint(k_gr, (B,), 0, N_GROUP, jnp.int32),
        'stim_type': jax.random.randint(k_st, (B,), 0, N_STIM, jnp.int32),
        'true_emo_seq': jax.random.randint(k_emo, (B, T), 0, N_EMO, jnp.int32),
    }
    # randn_like(std) from the PyTorch reparameterize: eps is drawn in glue and
    # the reparameterization arithmetic happens inside the kernel.
    eps = jax.random.normal(k_eps, (B, LATENT), jnp.float32)

    recon_logits, mu, logvar = emotion_cvae_forward(batch, params, eps)
    jax.block_until_ready((recon_logits, mu, logvar))

    assert recon_logits.shape == (B, T, N_EMO)
    assert mu.shape == (B, LATENT) and logvar.shape == (B, LATENT)
    assert jnp.all(jnp.isfinite(recon_logits))
    assert jnp.all(jnp.isfinite(mu)) and jnp.all(jnp.isfinite(logvar))
    print("KERNEL_OK")
</pallas_src>

<mosaic_0001>
module attributes {stable_mosaic.version = 11 : i64} {
  func.func @emotion_cvae_kernel(%arg0: memref<16x40xf32, #tpu.memory_space<vmem>>, %arg1: memref<16x96xf32, #tpu.memory_space<vmem>>, %arg2: memref<2x80xf32, #tpu.memory_space<vmem>>, %arg3: memref<216x32xf32, #tpu.memory_space<vmem>>, %arg4: memref<6x32xf32, #tpu.memory_space<vmem>>, %arg5: memref<18x32xf32, #tpu.memory_space<vmem>>) attributes {dimension_semantics = [], scalar_prefetch = 0 : i64, scratch_operands = 0 : i64, tpu.core_type = #tpu.core_type<tc>} {
    %c0 = arith.constant 0 : index
    %c0_0 = arith.constant 0 : index
    %0 = vector.load %arg0[%c0, %c0_0] : memref<16x40xf32, #tpu.memory_space<vmem>>, vector<16x40xf32>
    %c0_1 = arith.constant 0 : index
    %c0_2 = arith.constant 0 : index
    %1 = vector.load %arg1[%c0_1, %c0_2] : memref<16x96xf32, #tpu.memory_space<vmem>>, vector<16x96xf32>
    %c0_3 = arith.constant 0 : index
    %c0_4 = arith.constant 0 : index
    %2 = vector.load %arg2[%c0_3, %c0_4] : memref<2x80xf32, #tpu.memory_space<vmem>>, vector<2x80xf32>
    %c0_5 = arith.constant 0 : index
    %c0_6 = arith.constant 0 : index
    %3 = vector.load %arg3[%c0_5, %c0_6] : memref<216x32xf32, #tpu.memory_space<vmem>>, vector<216x32xf32>
    %c0_7 = arith.constant 0 : index
    %c0_8 = arith.constant 0 : index
    %4 = vector.load %arg4[%c0_7, %c0_8] : memref<6x32xf32, #tpu.memory_space<vmem>>, vector<6x32xf32>
    %5 = vector.extract_strided_slice %3 {offsets = [0, 0], sizes = [40, 32], strides = [1, 1]} : vector<216x32xf32> to vector<40x32xf32>
    %cst = arith.constant dense<0.000000e+00> : vector<16x32xf32>
    %6 = tpu.matmul %0, %5, %cst {dimension_numbers = #tpu.dot_dimension_numbers<[1], [0], [0], [1], [0, 0, 1, 1], [], []>} : vector<16x40xf32>, vector<40x32xf32>, vector<16x32xf32> -> vector<16x32xf32>
    %7 = vector.extract_strided_slice %4 {offsets = [0, 0], sizes = [1, 32], strides = [1, 1]} : vector<6x32xf32> to vector<1x32xf32>
    %8 = vector.broadcast %7 : vector<1x32xf32> to vector<16x32xf32>
    %9 = arith.addf %6, %8 : vector<16x32xf32>
    %10 = vector.extract_strided_slice %1 {offsets = [0, 0], sizes = [16, 32], strides = [1, 1]} : vector<16x96xf32> to vector<16x32xf32>
    %11 = arith.addf %9, %10 : vector<16x32xf32>
    %cst_9 = arith.constant 0.000000e+00 : f32
    %12 = vector.broadcast %cst_9 : f32 to vector<16x32xf32>
    %13 = arith.maximumf %11, %12 : vector<16x32xf32>
    %14 = vector.extract_strided_slice %1 {offsets = [0, 32], sizes = [16, 32], strides = [1, 1]} : vector<16x96xf32> to vector<16x32xf32>
    %15 = vector.extract_strided_slice %14 {offsets = [0, 0], sizes = [8, 32], strides = [1, 1]} : vector<16x32xf32> to vector<8x32xf32>
    %cst_10 = arith.constant dense<0.000000e+00> : vector<32xf32>
    %16 = vector.multi_reduction <add>, %15, %cst_10 [0] : vector<8x32xf32> to vector<32xf32>
    %17 = vector.shape_cast %16 : vector<32xf32> to vector<1x32xf32>
    %cst_11 = arith.constant 8.000000e+00 : f32
    %18 = vector.broadcast %cst_11 : f32 to vector<1x32xf32>
    %19 = arith.divf %17, %18 : vector<1x32xf32>
    %20 = vector.extract_strided_slice %14 {offsets = [8, 0], sizes = [8, 32], strides = [1, 1]} : vector<16x32xf32> to vector<8x32xf32>
    %cst_12 = arith.constant dense<0.000000e+00> : vector<32xf32>
    %21 = vector.multi_reduction <add>, %20, %cst_12 [0] : vector<8x32xf32> to vector<32xf32>
    %22 = vector.shape_cast %21 : vector<32xf32> to vector<1x32xf32>
    %cst_13 = arith.constant 8.000000e+00 : f32
    %23 = vector.broadcast %cst_13 : f32 to vector<1x32xf32>
    %24 = arith.divf %22, %23 : vector<1x32xf32>
    %25 = tpu.concatenate %19, %24 in 0 : vector<1x32xf32>, vector<1x32xf32> -> vector<2x32xf32>
    %26 = vector.extract_strided_slice %2 {offsets = [0, 0], sizes = [2, 32], strides = [1, 1]} : vector<2x80xf32> to vector<2x32xf32>
    %27 = tpu.concatenate %25, %26 in 1 : vector<2x32xf32>, vector<2x32xf32> -> vector<2x64xf32>
    %28 = vector.extract_strided_slice %3 {offsets = [40, 0], sizes = [64, 32], strides = [1, 1]} : vector<216x32xf32> to vector<64x32xf32>
    %cst_14 = arith.constant dense<0.000000e+00> : vector<2x32xf32>
    %29 = tpu.matmul %27, %28, %cst_14 {dimension_numbers = #tpu.dot_dimension_numbers<[1], [0], [0], [1], [0, 0, 1, 1], [], []>} : vector<2x64xf32>, vector<64x32xf32>, vector<2x32xf32> -> vector<2x32xf32>
    %30 = vector.extract_strided_slice %4 {offsets = [1, 0], sizes = [1, 32], strides = [1, 1]} : vector<6x32xf32> to vector<1x32xf32>
    %31 = vector.broadcast %30 : vector<1x32xf32> to vector<2x32xf32>
    %32 = arith.addf %29, %31 : vector<2x32xf32>
    %cst_15 = arith.constant 0.000000e+00 : f32
    %33 = vector.broadcast %cst_15 : f32 to vector<2x32xf32>
    %34 = arith.maximumf %32, %33 : vector<2x32xf32>
    %35 = vector.extract_strided_slice %3 {offsets = [104, 0], sizes = [32, 32], strides = [1, 1]} : vector<216x32xf32> to vector<32x32xf32>
    %cst_16 = arith.constant dense<0.000000e+00> : vector<2x32xf32>
    %36 = tpu.matmul %34, %35, %cst_16 {dimension_numbers = #tpu.dot_dimension_numbers<[1], [0], [0], [1], [0, 0, 1, 1], [], []>} : vector<2x32xf32>, vector<32x32xf32>, vector<2x32xf32> -> vector<2x32xf32>
    %37 = vector.extract_strided_slice %4 {offsets = [2, 0], sizes = [1, 32], strides = [1, 1]} : vector<6x32xf32> to vector<1x32xf32>
    %38 = vector.broadcast %37 : vector<1x32xf32> to vector<2x32xf32>
    %39 = arith.addf %36, %38 : vector<2x32xf32>
    %40 = vector.extract_strided_slice %39 {offsets = [0, 0], sizes = [2, 16], strides = [1, 1]} : vector<2x32xf32> to vector<2x16xf32>
    %41 = vector.extract_strided_slice %39 {offsets = [0, 16], sizes = [2, 16], strides = [1, 1]} : vector<2x32xf32> to vector<2x16xf32>
    %42 = vector.extract_strided_slice %2 {offsets = [0, 64], sizes = [2, 16], strides = [1, 1]} : vector<2x80xf32> to vector<2x16xf32>
    %cst_17 = arith.constant 5.000000e-01 : f32
    %43 = vector.broadcast %cst_17 : f32 to vector<2x16xf32>
    %44 = arith.mulf %43, %41 : vector<2x16xf32>
    %45 = math.exp %44 : vector<2x16xf32>
    %46 = arith.mulf %42, %45 : vector<2x16xf32>
    %47 = arith.addf %40, %46 : vector<2x16xf32>
    %48 = vector.extract_strided_slice %3 {offsets = [136, 0], sizes = [16, 32], strides = [1, 1]} : vector<216x32xf32> to vector<16x32xf32>
    %cst_18 = arith.constant dense<0.000000e+00> : vector<2x32xf32>
    %49 = tpu.matmul %47, %48, %cst_18 {dimension_numbers = #tpu.dot_dimension_numbers<[1], [0], [0], [1], [0, 0, 1, 1], [], []>} : vector<2x16xf32>, vector<16x32xf32>, vector<2x32xf32> -> vector<2x32xf32>
    %50 = vector.extract_strided_slice %4 {offsets = [3, 0], sizes = [1, 32], strides = [1, 1]} : vector<6x32xf32> to vector<1x32xf32>
    %51 = vector.broadcast %50 : vector<1x32xf32> to vector<2x32xf32>
    %52 = arith.addf %49, %51 : vector<2x32xf32>
    %53 = vector.extract_strided_slice %2 {offsets = [0, 32], sizes = [2, 32], strides = [1, 1]} : vector<2x80xf32> to vector<2x32xf32>
    %54 = arith.addf %52, %53 : vector<2x32xf32>
    %55 = vector.extract_strided_slice %54 {offsets = [0, 0], sizes = [1, 32], strides = [1, 1]} : vector<2x32xf32> to vector<1x32xf32>
    %56 = vector.shape_cast %55 : vector<1x32xf32> to vector<1x32xf32>
    %57 = vector.broadcast %56 : vector<1x32xf32> to vector<8x32xf32>
    %58 = vector.extract_strided_slice %54 {offsets = [1, 0], sizes = [1, 32], strides = [1, 1]} : vector<2x32xf32> to vector<1x32xf32>
    %59 = vector.shape_cast %58 : vector<1x32xf32> to vector<1x32xf32>
    %60 = vector.broadcast %59 : vector<1x32xf32> to vector<8x32xf32>
    %61 = tpu.concatenate %57, %60 in 0 : vector<8x32xf32>, vector<8x32xf32> -> vector<16x32xf32>
    %62 = vector.extract_strided_slice %1 {offsets = [0, 64], sizes = [16, 32], strides = [1, 1]} : vector<16x96xf32> to vector<16x32xf32>
    %63 = arith.addf %62, %61 : vector<16x32xf32>
    %64 = vector.extract_strided_slice %63 {offsets = [0, 0], sizes = [8, 32], strides = [1, 1]} : vector<16x32xf32> to vector<8x32xf32>
    %65 = vector.extract_strided_slice %13 {offsets = [0, 0], sizes = [8, 32], strides = [1, 1]} : vector<16x32xf32> to vector<8x32xf32>
    %66 = tpu.transpose %65, [1, 0] : vector<8x32xf32> -> vector<32x8xf32>
    %cst_19 = arith.constant dense<0.000000e+00> : vector<8x8xf32>
    %67 = tpu.matmul %64, %66, %cst_19 {dimension_numbers = #tpu.dot_dimension_numbers<[1], [0], [0], [1], [0, 0, 1, 1], [], []>} : vector<8x32xf32>, vector<32x8xf32>, vector<8x8xf32> -> vector<8x8xf32>
    %cst_20 = arith.constant 0.176776692 : f32
    %68 = vector.broadcast %cst_20 : f32 to vector<8x8xf32>
    %69 = arith.mulf %67, %68 : vector<8x8xf32>
    %cst_21 = arith.constant dense<0xFF800000> : vector<8xf32>
    %70 = vector.multi_reduction <maximumf>, %69, %cst_21 [1] : vector<8x8xf32> to vector<8xf32>
    %71 = vector.shape_cast %70 : vector<8xf32> to vector<8x1xf32>
    %72 = vector.broadcast %71 : vector<8x1xf32> to vector<8x8xf32>
    %73 = arith.subf %69, %72 : vector<8x8xf32>
    %74 = math.exp %73 : vector<8x8xf32>
    %cst_22 = arith.constant dense<0.000000e+00> : vector<8xf32>
    %75 = vector.multi_reduction <add>, %74, %cst_22 [1] : vector<8x8xf32> to vector<8xf32>
    %76 = vector.shape_cast %75 : vector<8xf32> to vector<8x1xf32>
    %77 = tpu.reciprocal %76 {approx = true} : vector<8x1xf32> -> vector<8x1xf32>
    %78 = vector.broadcast %77 : vector<8x1xf32> to vector<8x8xf32>
    %79 = arith.mulf %74, %78 : vector<8x8xf32>
    %cst_23 = arith.constant dense<0.000000e+00> : vector<8x32xf32>
    %80 = tpu.matmul %79, %65, %cst_23 {dimension_numbers = #tpu.dot_dimension_numbers<[1], [0], [0], [1], [0, 0, 1, 1], [], []>} : vector<8x8xf32>, vector<8x32xf32>, vector<8x32xf32> -> vector<8x32xf32>
    %81 = vector.extract_strided_slice %63 {offsets = [8, 0], sizes = [8, 32], strides = [1, 1]} : vector<16x32xf32> to vector<8x32xf32>
    %82 = vector.extract_strided_slice %13 {offsets = [8, 0], sizes = [8, 32], strides = [1, 1]} : vector<16x32xf32> to vector<8x32xf32>
    %83 = tpu.transpose %82, [1, 0] : vector<8x32xf32> -> vector<32x8xf32>
    %cst_24 = arith.constant dense<0.000000e+00> : vector<8x8xf32>
    %84 = tpu.matmul %81, %83, %cst_24 {dimension_numbers = #tpu.dot_dimension_numbers<[1], [0], [0], [1], [0, 0, 1, 1], [], []>} : vector<8x32xf32>, vector<32x8xf32>, vector<8x8xf32> -> vector<8x8xf32>
    %cst_25 = arith.constant 0.176776692 : f32
    %85 = vector.broadcast %cst_25 : f32 to vector<8x8xf32>
    %86 = arith.mulf %84, %85 : vector<8x8xf32>
    %cst_26 = arith.constant dense<0xFF800000> : vector<8xf32>
    %87 = vector.multi_reduction <maximumf>, %86, %cst_26 [1] : vector<8x8xf32> to vector<8xf32>
    %88 = vector.shape_cast %87 : vector<8xf32> to vector<8x1xf32>
    %89 = vector.broadcast %88 : vector<8x1xf32> to vector<8x8xf32>
    %90 = arith.subf %86, %89 : vector<8x8xf32>
    %91 = math.exp %90 : vector<8x8xf32>
    %cst_27 = arith.constant dense<0.000000e+00> : vector<8xf32>
    %92 = vector.multi_reduction <add>, %91, %cst_27 [1] : vector<8x8xf32> to vector<8xf32>
    %93 = vector.shape_cast %92 : vector<8xf32> to vector<8x1xf32>
    %94 = tpu.reciprocal %93 {approx = true} : vector<8x1xf32> -> vector<8x1xf32>
    %95 = vector.broadcast %94 : vector<8x1xf32> to vector<8x8xf32>
    %96 = arith.mulf %91, %95 : vector<8x8xf32>
    %cst_28 = arith.constant dense<0.000000e+00> : vector<8x32xf32>
    %97 = tpu.matmul %96, %82, %cst_28 {dimension_numbers = #tpu.dot_dimension_numbers<[1], [0], [0], [1], [0, 0, 1, 1], [], []>} : vector<8x8xf32>, vector<8x32xf32>, vector<8x32xf32> -> vector<8x32xf32>
    %98 = tpu.concatenate %80, %97 in 0 : vector<8x32xf32>, vector<8x32xf32> -> vector<16x32xf32>
    %99 = arith.addf %63, %98 : vector<16x32xf32>
    %100 = vector.extract_strided_slice %3 {offsets = [152, 0], sizes = [32, 32], strides = [1, 1]} : vector<216x32xf32> to vector<32x32xf32>
    %cst_29 = arith.constant dense<0.000000e+00> : vector<16x32xf32>
    %101 = tpu.matmul %99, %100, %cst_29 {dimension_numbers = #tpu.dot_dimension_numbers<[1], [0], [0], [1], [0, 0, 1, 1], [], []>} : vector<16x32xf32>, vector<32x32xf32>, vector<16x32xf32> -> vector<16x32xf32>
    %102 = vector.extract_strided_slice %4 {offsets = [4, 0], sizes = [1, 32], strides = [1, 1]} : vector<6x32xf32> to vector<1x32xf32>
    %103 = vector.broadcast %102 : vector<1x32xf32> to vector<16x32xf32>
    %104 = arith.addf %101, %103 : vector<16x32xf32>
    %cst_30 = arith.constant 0.000000e+00 : f32
    %105 = vector.broadcast %cst_30 : f32 to vector<16x32xf32>
    %106 = arith.maximumf %104, %105 : vector<16x32xf32>
    %107 = vector.extract_strided_slice %3 {offsets = [184, 0], sizes = [32, 32], strides = [1, 1]} : vector<216x32xf32> to vector<32x32xf32>
    %cst_31 = arith.constant dense<0.000000e+00> : vector<16x32xf32>
    %108 = tpu.matmul %106, %107, %cst_31 {dimension_numbers = #tpu.dot_dimension_numbers<[1], [0], [0], [1], [0, 0, 1, 1], [], []>} : vector<16x32xf32>, vector<32x32xf32>, vector<16x32xf32> -> vector<16x32xf32>
    %109 = vector.extract_strided_slice %4 {offsets = [5, 0], sizes = [1, 32], strides = [1, 1]} : vector<6x32xf32> to vector<1x32xf32>
    %110 = vector.broadcast %109 : vector<1x32xf32> to vector<16x32xf32>
    %111 = arith.addf %108, %110 : vector<16x32xf32>
    %c0_32 = arith.constant 0 : index
    %c0_33 = arith.constant 0 : index
    %112 = vector.load %arg5[%c0_32, %c0_33] : memref<18x32xf32, #tpu.memory_space<vmem>>, vector<16x32xf32>
    tpu.vector_store %arg5[%c0_32, %c0_33], %111 {strides = array<i32>} : memref<18x32xf32, #tpu.memory_space<vmem>>, vector<16x32xf32>,
    %c16 = arith.constant 16 : index
    %c0_34 = arith.constant 0 : index
    %113 = vector.load %arg5[%c16, %c0_34] : memref<18x32xf32, #tpu.memory_space<vmem>>, vector<2x32xf32>
    tpu.vector_store %arg5[%c16, %c0_34], %39 {strides = array<i32>} : memref<18x32xf32, #tpu.memory_space<vmem>>, vector<2x32xf32>,
    return
  }
}

</mosaic_0001>

<bundles_post_ra>
// kernel: tpu_custom_call.1
= control target key start
LH: loop header
LB: loop body
LE: loop exit
PB: predicated region body
PF: predicated region fallthrough
CT: control target
= control target key end

     0   :  { %vm144_vm0 = vcmask 523520   ;;  %v1216_v7 = vmov 0.0|0.0   ;;  %s1460_s0 = inlined_call_operand.vmem [shape: f32[16,40], index: 0, kind: input, shape index: {}]   ;;  %s1461_s1 = inlined_call_operand.vmem [shape: f32[16,96], index: 1, kind: input, shape index: {}]   ;;  %s1462_s2 = inlined_call_operand.vmem [shape: f32[2,80], index: 2, kind: input, shape index: {}]   ;;  %s1463_s3 = inlined_call_operand.vmem [shape: f32[216,32], index: 3, kind: input, shape index: {}]   ;;  %s1464_s4 = inlined_call_operand.vmem [shape: f32[6,32], index: 4, kind: input, shape index: {}]   ;;  %s1465_s5 = inlined_call_operand.hbm [shape: f32[18,32], index: 5, kind: output, shape index: {}]  }
   0x1   :  { %v1259_v0 = vld [vmem:[%s1461_s1] sm:$0xff]  ;;  %v1264_v1 = vld [vmem:[%s1461_s1 + $0x8] sm:$0xff]  ;;  %1135 = vmatprep.subr.bf16.mxu1 %v1216_v7  ;;  %v32_v8 = vld [vmem:[%s1463_s3 + $0x30] sm:$0xff] }
   0x2   :  { %v145_v2 = vsel %vm144_vm0, %v1259_v0, 0.0  ;;  %v154_v3 = vsel %vm144_vm0, %v1264_v1, 0.0  ;;  %v31_v4 = vld [vmem:[%s1463_s3 + $0x28] sm:$0xff]  ;;  %v33_v9 = vld [vmem:[%s1463_s3 + $0x38] sm:$0xff]  ;;  %v34_v10 = vld [vmem:[%s1463_s3 + $0x40] sm:$0xff] }
   0x3   :  { %v146_v5 = vrot.slane %v145_v2, 4  ;;  %v155_v6 = vrot.slane %v154_v3, 4  ;;  %v1136_v11 = vpack.c.bf16 %v32_v8, %v31_v4 }
   0x5   :  { %v147_v12 = vadd.f32 %v146_v5, %v145_v2  ;;  %v156_v13 = vadd.f32 %v155_v6, %v154_v3 }
   0x6   :  { %10 = vsyncpa [#allocation3], 0  ;;  %1137 = vmatpush3.bf16.msra.mxu1 %v1136_v11  ;;  %v1139_v14 = vpack.c.bf16 %v34_v10, %v33_v9  ;;  %v35_v17 = vld [vmem:[%s1463_s3 + $0x48] sm:$0xff]  ;;  %v36_v18 = vld [vmem:[%s1463_s3 + $0x50] sm:$0xff]  ;;  %vm1217_vm1 = vmmov 0   ;;  %v1218_v22 = vmov 0.0   ;;  %v54_v52 = vlaneseq }
   0x7   :  { %v148_v15 = vrot.slane %v147_v12, 2  ;;  %v157_v16 = vrot.slane %v156_v13, 2  ;;  %1138 = vmatprep.subr.bf16.mxu1 %v1216_v7  ;;  %v37_v21 = vld [vmem:[%s1463_s3 + $0x58] sm:$0xff]  ;;  %1064 = vmatprep.mubr.msk.f32.mxu1 %vm1217_vm1, %v1218_v22  ;;  %v1142_v23 = vpack.c.bf16 %v36_v18, %v35_v17  ;;  %v26_v24 = vld [vmem:[%s1463_s3] sm:$0xff]  ;;  %v27_v25 = vld [vmem:[%s1463_s3 + $0x8] sm:$0xff]  ;;  %vm58_vm2 = vcmask 326656  }
   0x8   :  { %v28_v26 = vld [vmem:[%s1463_s3 + $0x10] sm:$0xff]  ;;  %v38_v29 = vld [vmem:[%s1463_s3 + $0x60] sm:$0xff]  ;;  %v1127_v30 = vpack.c.bf16 %v27_v25, %v26_v24  ;;  %v29_v31 = vld [vmem:[%s1463_s3 + $0x18] sm:$0xff]  ;;  %vm162_vm3 = vcmask 1040384   ;;  %s1219_s24 = smov 96   ;;  %s1220_s7 = smov 32  }
   0x9   :  { %v149_v19 = vadd.f32 %v148_v15, %v147_v12  ;;  %v158_v20 = vadd.f32 %v157_v16, %v156_v13  ;;  %v21_v32 = vld [vmem:[%s1460_s0] sm:$0xff]  ;;  %v1131_v33 = vpack.c.bf16 %v29_v31, %v28_v26  ;;  %v1145_v36 = vpack.c.bf16 %v38_v29, %v37_v21  ;;  %v39_v41 = vld [vmem:[%s1463_s3 + $0x68] sm:$0xff]  ;;  %v40_v42 = vld [vmem:[%s1463_s3 + $0x70] sm:$0xff]  ;;  %s1221_s15 = smov 48   ;;  %s1222_s16 = smov 64  }
   0xa   :  { %1140 = vmatpush3.bf16.msra.mxu1 %v1139_v14  ;;  %1045 = vmatprep.mubr.msk.f32.mxu0 %vm58_vm2, %v21_v32  ;;  %v30_v40 = vld [vmem:[%s1463_s3 + $0x20] sm:$0xff]  ;;  %v22_v44 = vld [vmem:[%s1460_s0 + $0x8] sm:$0xff]  ;;  %v1148_v45 = vpack.c.bf16 %v40_v42, %v39_v41  ;;  %vm172_vm4 = vcmask 261120   ;;  %vm178_vm5 = vcmask 523264   ;;  %v41_v49 = vld [vmem:[%s1463_s3 + $0x78] sm:$0xff]  ;;  %v1349_v53 = vshrl.u32 %v54_v52, 7 }
   0xb   :  { %v150_v27 = vrot.slane %v149_v19, 1  ;;  %v159_v28 = vrot.slane %v158_v20, 1  ;;  %1141 = vmatprep.subr.bf16.mxu1 %v1216_v7  ;;  %1128 = vmatprep.subr.bf16.mxu0 %v1127_v30  ;;  %v1326_v43 = vld [vmem:[%s1462_s2] sm:$0x3]  ;;  %vm958_vm6 = vcmask 254976   ;;  %v43_v14 = vld [vmem:[%s1463_s3 + $0x88] sm:$0xff] }
   0xc   :  { %1130 = vmatpush3.bf16.msra.mxu0 %v1127_v30  ;;  %v42_v50 = vld [vmem:[%s1463_s3 + $0x80] sm:$0xff]  ;;  %v56_v54 = vsub.s32 0, %v1349_v53  ;;  %v176_v60 = vsub.s32 1, %v1349_v53  ;;  %v44_v15 = vld [vmem:[%s1463_s3 + $0x90] sm:$0xff]  ;;  %vm347_vm7 = vcmask 130048   ;;  %vm522_vm8 = vcmask 64512  }
   0xd   :  { %v151_v34 = vadd.f32 %v150_v27, %v149_v19  ;;  %v160_v35 = vadd.f32 %v159_v28, %v158_v20  ;;  %1132 = vmatprep.subr.bf16.mxu0 %v1131_v33  ;;  %v1151_v51 = vpack.c.bf16 %v42_v50, %v41_v49  ;;  %v1355_v55 = vld [vmem:[%s1464_s4] sm:$0x3f]  ;;  %v1154_v16 = vpack.c.bf16 %v44_v15, %v43_v14 }
   0xe   :  { %1143 = vmatpush3.bf16.msra.mxu1 %v1142_v23  ;;  %v57_v56 = vrot.slane %v1355_v55, %v56_v54  ;;  %v177_v62 = vrot.slane %v1355_v55, %v176_v60  ;;  %v345_v23 = vsub.s32 3, %v1349_v53 }
   0xf   :  { %v153_v37 = vmul.f32 0.125, %v151_v34  ;;  %v161_v38 = vmul.f32 0.125, %v160_v35  ;;  %1144 = vmatprep.subr.bf16.mxu1 %v1216_v7 }
  0x10   :  { %1134 = vmatpush3.bf16.msra.mxu0 %v1131_v33  ;;  %v346_v24 = vrot.slane %v1355_v55, %v345_v23 }
  0x11   :  { %v163_v39 = vsel %vm162_vm3, %v153_v37, %v161_v38  ;;  %1043 = vmatprep.subr.mxu0 %v30_v40 }
  0x12   :  { %165 = vrot.lane.b32.xlu0 %v163_v39, %s1219_s24  ;;  %1146 = vmatpush3.bf16.msra.mxu1 %v1145_v36 }
  0x13   :  { %1153 = vmatprep.subr.bf16.mxu1 %v1216_v7 }
  0x14   :  { %1044 = vmatpush3.msra.mxu0 %v30_v40 }
  0x15   :  { %1046 = vmatmul.mubr.msk.f32.vlgmr.msra.gmra.mrb[0].mxu0 %vm58_vm2, %v22_v44  ;;  %1147 = vmatprep.subr.bf16.mxu0 %v1216_v7 }
  0x16   :  { %169 = vrot.lane.b32.xlu0 %v1326_v43, %s1220_s7  ;;  %1149 = vmatpush3.bf16.msra.mxu0 %v1148_v45 }
  0x17   :  { %1075 = vmatprep.mubr.msk.f32.mxu0 %vm1217_vm1, %v1218_v22  ;;  %1150 = vmatprep.subr.bf16.mxu0 %v1216_v7  ;;  %v255_v7 = vsub.s32 2, %v1349_v53 }
  0x19   :  { %v256_v8 = vrot.slane %v1355_v55, %v255_v7 }
  0x1a   :  { %421 = vrot.lane.b32.xlu0 %v1326_v43, %s1219_s24  ;;  %1152 = vmatpush3.bf16.msra.mxu0 %v1151_v51 }
  0x1b   :  { %1085 = vmatprep.subr.mxu0 %v1218_v22 }
  0x84   :  { %v166_v46 = vpop.permute.xlu0 %165 }
  0x88   :  { %v170_v47 = vpop.permute.xlu0 %169 }
  0x89   :  { %v173_v48 = vsel %vm172_vm4, %v166_v46, %v170_v47 }
  0x8a   :  { %1065 = vmatmul.mubr.msk.f32.vlgmr.msra.gmra.mrb[0].mxu1 %vm178_vm5, %v173_v48 }
  0x8b   :  { %1082 = vmatprep.mubr.msk.f32.mxu1 %vm1217_vm1, %v1218_v22  ;;  %1155 = vmatpush3.bf16.msra.mxu1 %v1154_v16 }
  0x8c   :  { %1090 = vmatprep.subr.mxu1 %v1218_v22  ;;  %v422_v26 = vpop.permute.xlu0 %421 }
  0xe8   :  { %v1047_v57 = vpop.f32.mrb[0].mxu0 }
  0xe9   :  { %v137_v58 = vadd.f32 %v1047_v57, %v57_v56  ;;  %v131_v59 = vpop.f32.mrb[1].mxu0 }
  0xea   :  { %v132_v61 = vadd.f32 %v131_v59, %v57_v56 }
  0xeb   :  { %v141_v36 = vadd.f32 %v137_v58, %v1264_v1 }
  0xec   :  { %v140_v63 = vadd.f32 %v132_v61, %v1259_v0 }
  0xed   :  { %v143_v37 = vmax.f32 %v141_v36, 0.0 }
  0xee   :  { %v142_v5 = vmax.f32 %v140_v63, 0.0 }
 0x15d   :  { %v248_v2 = vpop.f32.mrb[0].mxu1 }
 0x15e   :  { %v249_v3 = vadd.f32 %v248_v2, %v177_v62  ;;  %v1066_v4 = vpop.f32.mrb[1].mxu1  ;;  %v45_v2 = vld [vmem:[%s1463_s3 + $0x98] sm:$0xff] }
 0x160   :  { %v252_v6 = vmax.f32 %v249_v3, 0.0  ;;  %v46_v3 = vld [vmem:[%s1463_s3 + $0xa0] sm:$0xff] }
 0x161   :  { %v1156_v4 = vpack.c.bf16 %v46_v3, %v45_v2 }
 0x162   :  { %1076 = vmatmul.mubr.msk.f32.vlgmr.msra.gmra.mrb[2].mxu0 %vm172_vm4, %v252_v6 }
 0x163   :  { %1086 = vmatpush3.xpose.msk.msra.mxu0 %vm172_vm4, %v142_v5  ;;  %1087 = vmatprep.mubr.msk.f32.mxu0 %vm1217_vm1, %v1218_v22 }
 0x164   :  { %1095 = vmatprep.subr.mxu0 %v1218_v22 }
 0x235   :  { %v326_v9 = vpop.f32.mrb[2].mxu0 }
 0x236   :  { %v327_v10 = vadd.f32 %v326_v9, %v256_v8  ;;  %v1077_v11 = vpop.f32.mrb[3].mxu0  ;;  %v47_v8 = vld [vmem:[%s1463_s3 + $0xa8] sm:$0xff]  ;;  %v48_v9 = vld [vmem:[%s1463_s3 + $0xb0] sm:$0xff] }
 0x237   :  { %v49_v11 = vld [vmem:[%s1463_s3 + $0xb8] sm:$0xff] }
 0x238   :  { %v330_v12 = vmul.f32 0.5, %v327_v10  ;;  %959 = vst.msk [vmem:[#allocation2 + $0x10] sm:$0x3] %vm958_vm6, %v327_v10 }
 0x23a   :  { %v331_v13 = vmul.f32 1.442695, %v330_v12  ;;  %v50_v12 = vld [vmem:[%s1463_s3 + $0xc0] sm:$0xff] }
 0x23c   :  { %1182 = vpow2.f32 %v331_v13  ;;  %v1164_v13 = vpack.c.bf16 %v50_v12, %v49_v11 }
 0x246   :  { %v1183_v17 = vpop.eup %1182 }
 0x247   :  { %334 = vrot.lane.b32.xlu1 %v1183_v17, %s1221_s15 }
 0x2b9   :  { %v335_v18 = vpop.permute.xlu1 %334 }
 0x2ba   :  { %v337_v19 = vmul.f32 %v335_v18, %v1326_v43 }
 0x2bc   :  { %339 = vrot.lane.b32.xlu1 %v337_v19, %s1222_s16 }
 0x32e   :  { %v340_v20 = vpop.permute.xlu1 %339 }
 0x32f   :  { %v342_v21 = vadd.f32 %v340_v20, %v327_v10  ;;  %v1160_v10 = vpack.c.bf16 %v48_v9, %v47_v8  ;;  %v51_v20 = vld [vmem:[%s1463_s3 + $0xc8] sm:$0xff] }
 0x331   :  { %1083 = vmatmul.mubr.msk.f32.vlgmr.msra.gmra.mrb[2].mxu1 %vm347_vm7, %v342_v21  ;;  %v52_v21 = vld [vmem:[%s1463_s3 + $0xd0] sm:$0xff]  ;;  %s1223_s3 = smov [#allocation2]  }
 0x332   :  { %1091 = vmatpush3.msra.mxu1 %v142_v5  ;;  %1092 = vmatprep.mubr.msk.f32.mxu1 %vm1217_vm1, %v1218_v22  ;;  %v1168_v23 = vpack.c.bf16 %v52_v21, %v51_v20  ;;  %s965_s7 = sshll.u32 %s1223_s3, 4  ;;  %s966_s7 = int_to_ptr.vmem [resolvable:$true] %s965_s7 }
 0x333   :  { %1100 = vmatprep.subr.mxu1 %v1218_v22  ;;  %s1192_s0 = scalar_lea.vmem %s966_s7, 384  ;;  %p1197_p1 = scmp.lt.s32.totalorder %s966_s7, %s966_s7 }
 0x334   :  { %p1193_p0 = scmp.ne.s32.totalorder %s966_s7, %s1192_s0  ;;  %p1198_p2 = scmp.lt.s32.totalorder %s1192_s0, %s1192_s0 }
 0x336   :  { %p1199_p3 = por %p1198_p2, %p1197_p1 }
 0x338   :  { %p1200_p4 = pnand %p1199_p3, %p1193_p0 }
 0x404   :  { %v417_v25 = vpop.f32.mrb[2].mxu1 }
 0x405   :  { %v418_v27 = vadd.f32 %v417_v25, %v346_v24  ;;  %v1084_v28 = vpop.f32.mrb[3].mxu1  ;;  %v782_v24 = vsub.s32 4, %v1349_v53 }
 0x407   :  { %v424_v29 = vadd.f32 %v422_v26, %v418_v27  ;;  %v783_v25 = vrot.slane %v1355_v55, %v782_v24 }
 0x409   :  { %v428_v30 = vrot.slane %v424_v29, %v56_v54  ;;  %v432_v31 = vrot.slane %v424_v29, %v176_v60 }
 0x40b   :  { %437 = vrot.lane.b32.xlu0 %v432_v31, %s1222_s16  ;;  %435 = vrot.lane.b32.xlu1 %v428_v30, %s1222_s16 }
 0x47d   :  { %v438_v32 = vpop.permute.xlu0 %437  ;;  %v436_v33 = vpop.permute.xlu1 %435 }
 0x47e   :  { %v1385_v34 = vadd.f32 %v438_v32, %v1264_v1  ;;  %v1388_v35 = vadd.f32 %v436_v33, %v1259_v0  ;;  %v873_v32 = vsub.s32 5, %v1349_v53 }
 0x480   :  { %608 = vrot.lane.b32.xlu0 %v1385_v34, %s1222_s16  ;;  %444 = vrot.lane.b32.xlu1 %v1388_v35, %s1222_s16  ;;  %v874_v33 = vrot.slane %v1355_v55, %v873_v32 }
 0x4f2   :  { %v445_v38 = vpop.permute.xlu1 %444  ;;  %v609_v39 = vpop.permute.xlu0 %608 }
 0x4f3   :  { %1088 = vmatmul.mubr.msk.f32.vlgmr.msra.gmra.mrb[4].mxu0 %vm172_vm4, %v445_v38 }
 0x4f4   :  { %1096 = vmatpush3.xpose.msk.msra.mxu0 %vm172_vm4, %v143_v37  ;;  %1097 = vmatprep.mubr.msk.f32.mxu0 %vm1217_vm1, %v1218_v22 }
 0x4f5   :  { %1157 = vmatprep.subr.bf16.mxu0 %v1156_v4 }
 0x4f7   :  { %1098 = vmatmul.mubr.msk.f32.vlgmr.msra.gmra.mrb[6].mxu0 %vm172_vm4, %v609_v39 }
 0x4f8   :  { %1159 = vmatpush3.bf16.msra.mxu0 %v1156_v4 }
 0x4f9   :  { %1161 = vmatprep.subr.bf16.mxu0 %v1160_v10 }
 0x4fc   :  { %1163 = vmatpush3.bf16.msra.mxu0 %v1160_v10 }
 0x5c6   :  { %v517_v0 = vpop.f32.mrb[4].mxu0 }
 0x5c7   :  { %v521_v40 = vmul.f32 0.17677669, %v517_v0  ;;  %v1089_v41 = vpop.f32.mrb[5].mxu0 }
 0x5c9   :  { %v523_v42 = vsel %vm522_vm8, %v521_v40, -inf }
 0x5ca   :  { %524 = vmax.xlane.f32.xlu1 %v523_v42  ;;  %v681_v1 = vpop.f32.mrb[6].mxu0 }
 0x5cb   :  { %v685_v43 = vmul.f32 0.17677669, %v681_v1  ;;  %v1099_v44 = vpop.f32.mrb[7].mxu0 }
 0x5cd   :  { %v686_v45 = vsel %vm522_vm8, %v685_v43, -inf }
 0x5ce   :  { %687 = vmax.xlane.f32.xlu0 %v686_v45 }
 0x657   :  { %v525_v46 = vpop.xlane.xlu1 %524 }
 0x658   :  { %v526_v47 = vsub.f32 %v521_v40, %v525_v46 }
 0x65a   :  { %v527_v48 = vmul.f32 1.442695, %v526_v47 }
 0x65b   :  { %v688_v49 = vpop.xlane.xlu0 %687 }
 0x65c   :  { %1184 = vpow2.f32 %v527_v48  ;;  %v689_v50 = vsub.f32 %v685_v43, %v688_v49 }
 0x65e   :  { %v690_v51 = vmul.f32 1.442695, %v689_v50 }
 0x660   :  { %1186 = vpow2.f32 %v690_v51 }
 0x666   :  { %v1185_v52 = vpop.eup %1184 }
 0x667   :  { %v529_v54 = vsel %vm522_vm8, %v1185_v52, 0.0 }
 0x668   :  { %530 = vadd.xlane.f32.xlu0 %v529_v54 }
 0x66a   :  { %v1187_v56 = vpop.eup %1186 }
 0x66b   :  { %v692_v57 = vsel %vm522_vm8, %v1187_v56, 0.0 }
 0x66c   :  { %693 = vadd.xlane.f32.xlu1 %v692_v57 }
 0x6f5   :  { %v531_v58 = vpop.xlane.xlu0 %530 }
 0x6f6   :  { %1188 = vrcp.f32 %v531_v58 }
 0x6f9   :  { %v694_v59 = vpop.xlane.xlu1 %693 }
 0x6fa   :  { %1190 = vrcp.f32 %v694_v59 }
 0x700   :  { %v1189_v60 = vpop.eup %1188 }
 0x701   :  { %v533_v61 = vmul.f32 %v1189_v60, %v1185_v52 }
 0x703   :  { %1093 = vmatmul.mubr.msk.f32.vlgmr.msra.gmra.mrb[4].mxu1 %vm522_vm8, %v533_v61 }
 0x704   :  { %v1191_v62 = vpop.eup %1190  ;;  %1101 = vmatpush3.msra.mxu1 %v143_v37  ;;  %1102 = vmatprep.mubr.msk.f32.mxu1 %vm1217_vm1, %v1218_v22 }
 0x705   :  { %v696_v63 = vmul.f32 %v1191_v62, %v1187_v56  ;;  %1165 = vmatprep.subr.bf16.mxu1 %v1164_v13 }
 0x707   :  { %1103 = vmatmul.mubr.msk.f32.vlgmr.msra.gmra.mrb[6].mxu1 %vm522_vm8, %v696_v63 }
 0x708   :  { %1167 = vmatpush3.bf16.msra.mxu1 %v1164_v13 }
 0x709   :  { %1169 = vmatprep.subr.bf16.mxu1 %v1168_v23 }
 0x70c   :  { %1171 = vmatpush3.bf16.msra.mxu1 %v1168_v23 }
 0x7d6   :  { %v603_v5 = vpop.f32.mrb[4].mxu1 }
 0x7d7   :  { %772 = vrot.lane.b32.xlu0 %v603_v5, %s1222_s16  ;;  %v1094_v6 = vpop.f32.mrb[5].mxu1 }
 0x7da   :  { %v766_v7 = vpop.f32.mrb[6].mxu1 }
 0x7db   :  { %774 = vrot.lane.b32.xlu1 %v766_v7, %s1222_s16  ;;  %v1104_v22 = vpop.f32.mrb[7].mxu1 }
 0x849   :  { %v773_v14 = vpop.permute.xlu0 %772 }
 0x84a   :  { %v778_v15 = vadd.f32 %v773_v14, %v1388_v35 }
 0x84c   :  { %786 = vrot.lane.b32.xlu1 %v778_v15, %s1222_s16 }
 0x84d   :  { %v775_v16 = vpop.permute.xlu1 %774 }
 0x84e   :  { %v779_v17 = vadd.f32 %v775_v16, %v1385_v34 }
 0x850   :  { %788 = vrot.lane.b32.xlu0 %v779_v17, %s1222_s16 }
 0x8be   :  { %v787_v18 = vpop.permute.xlu1 %786 }
 0x8bf   :  { %1113 = vmatprep.mubr.msk.f32.mxu0 %vm172_vm4, %v787_v18 }
 0x8c2   :  { %v789_v19 = vpop.permute.xlu0 %788 }
 0x8c3   :  { %1114 = vmatmul.mubr.msk.f32.vlgmr.msra.gmra.mrb[8].mxu0 %vm172_vm4, %v789_v19 }
 0x996   :  { %v1115_v26 = vpop.f32.mrb[8].mxu0 }
 0x997   :  { %v866_v27 = vadd.f32 %v1115_v26, %v783_v25  ;;  %v860_v28 = vpop.f32.mrb[9].mxu0 }
 0x998   :  { %v861_v29 = vadd.f32 %v860_v28, %v783_v25 }
 0x999   :  { %v870_v31 = vmax.f32 %v866_v27, 0.0 }
 0x99a   :  { %v869_v30 = vmax.f32 %v861_v29, 0.0 }
 0x99c   :  { %1124 = vmatprep.mubr.msk.f32.mxu1 %vm172_vm4, %v869_v30 }
 0x99d   :  { %1125 = vmatmul.mubr.msk.f32.vlgmr.msra.gmra.mrb[8].mxu1 %vm172_vm4, %v870_v31 }
 0xa70   :  { %v1126_v34 = vpop.f32.mrb[8].mxu1 }
 0xa71   :  { %v953_v35 = vadd.f32 %v1126_v34, %v874_v33  ;;  %v947_v36 = vpop.f32.mrb[9].mxu1 }
 0xa72   :  { %v948_v37 = vadd.f32 %v947_v36, %v874_v33 }
 0xa73   :  { %957 = vst.msk [vmem:[#allocation2 + $0x8] sm:$0xff] %vm172_vm4, %v953_v35 }
 0xa74   :  { %956 = vst.msk [vmem:[#allocation2] sm:$0xff] %vm172_vm4, %v948_v37 }
 0xa75   :  { %1203 = shalt.err (!%p1200_p4)
}
 0xa76   :  { %s1204_s9 = scalar_lea.hbm %s1465_s5, 384 }
 0xa77   :  { %p1205_p5 = scmp.ne.s32.totalorder %s1465_s5, %s1204_s9  ;;  %p1208_p6 = scmp.lt.u32.totalorder %s1204_s9, %s1465_s5 }
 0xa79   :  { %p1210_p7 = pnand %p1208_p6, %p1205_p5 }
 0xa7b   :  { %1213 = shalt.err (!%p1210_p7)
}
 0xa7c   :  { %s1224_s13 = smov 128   ;;  %s1225_s14 = smov 8  }
 0xa7d   :  { %971 = dma.vmem_to_hbm [thread:$0]  %s966_s7, 384, %s1465_s5, [#allocation3], %s1224_s13, %s1224_s13, %s1225_s14  }
 0xa7e   :  { %1214 = dma.done.wait [#allocation3], 384  }
 0xa7f   :  { %1215 = vsyncadd [#allocation3], 4294966912 }
 0xa80   :  { %975 = vsyncpa [#allocation3], 1 }

</bundles_post_ra>
